<compile_context>
chip_gen: v5e
topology: v5e:2x2
jax: 0.10.0
libtpu: 0.0.40
codegen_flags: <defaults>
</compile_context>

<pallas_src>
import numpy as np

import jax
import jax.numpy as jnp
from jax.experimental import pallas as pl
from jax.experimental.pallas import tpu as pltpu


_VMEM_LIMIT_BYTES = 28 * 1024 * 1024      # < v7x 64 MiB physical; > v5e 16 MiB default
_TILE_VMEM_BUDGET = _VMEM_LIMIT_BYTES // 2


def _cdiv(a, b):
    return -(-a // b)


def _round_up(x, m):
    return (x + m - 1) // m * m


def _pick_tile_m(m_pad, n, k, oc, out_bytes):
    """Lane tile over the per-image patch axis (multiple of 128)."""
    # Target >= ~8 total grid steps (v7x megacore + double-buffer overlap), but keep
    # tiles >= 512 lanes where possible to amortize the ~0.35us per-step overhead.
    steps_per_image = max(1, _cdiv(8, max(n, 1)))
    tm = min(16384, m_pad, max(512, _round_up(_cdiv(m_pad, steps_per_image), 128)))
    tm = max(tm, 128)

    def footprint(t):  # 2x double-buffered in/out blocks + resident weights/bias
        return 2 * (k * t * 2) + 2 * (oc * t * out_bytes) + oc * k * 2 + oc * 128 * 4

    while tm > 128 and footprint(tm) > _TILE_VMEM_BUDGET:
        tm = max(128, _round_up(tm // 2, 128))
    return tm


def _matmul_bias_relu_kernel(w_ref, b_ref, x_ref, o_ref):
    # w_ref: (OC, K)  bf16  conv weight with BN scale folded in
    # b_ref: (OC, 1)  f32   folded BN bias
    # x_ref: (K, TM)  bf16  transposed patch tile (lane dim = patch index)
    # o_ref: (OC, TM) out dtype
    acc = jnp.dot(w_ref[...], x_ref[...], preferred_element_type=jnp.float32)
    o_ref[...] = jnp.maximum(acc + b_ref[...], 0.0).astype(o_ref.dtype)


def downsample_x4(x, conv_w, gamma, beta, running_mean, running_var,
                  eps=1e-5, out_dtype=jnp.bfloat16):
    """x: (N, C, H, W); conv_w: (OC, C, 4, 4). Returns (N, OC, H//4, W//4)."""
    N, C, H, W = x.shape
    OC = conv_w.shape[0]
    Ho, Wo = H // 4, W // 4                      # PyTorch conv floor-crops the remainder
    K = C * 16
    Mhw = Ho * Wo
    Mpad = _round_up(max(Mhw, 1), 128)           # lane alignment only (usually a no-op)

    # ---- space-to-depth (layout glue; exposed to XLA input fusion) ----
    xc = x[:, :, : Ho * 4, : Wo * 4]
    patches = (
        xc.reshape(N, C, Ho, 4, Wo, 4)
        .transpose(0, 1, 3, 5, 2, 4)             # (N, C, kh, kw, Ho, Wo)
        .reshape(N, K, Mhw)
        .astype(jnp.bfloat16)
    )
    if Mpad != Mhw:
        patches = jnp.pad(patches, ((0, 0), (0, 0), (0, Mpad - Mhw)))

    # ---- fold BatchNorm (eval) into conv weight + per-channel bias ----
    scale = (gamma / jnp.sqrt(running_var + eps)).astype(jnp.float32)
    bias = (beta - running_mean * scale).astype(jnp.float32).reshape(OC, 1)
    w_scaled = (conv_w.reshape(OC, K).astype(jnp.float32) * scale[:, None]).astype(
        jnp.bfloat16
    )

    out_bytes = np.dtype(out_dtype).itemsize
    TM = _pick_tile_m(Mpad, N, K, OC, out_bytes)
    grid = (N, _cdiv(Mpad, TM))

    out = pl.pallas_call(
        _matmul_bias_relu_kernel,
        out_shape=jax.ShapeDtypeStruct((N, OC, Mpad), out_dtype),
        grid=grid,
        in_specs=[
            pl.BlockSpec((OC, K), lambda n, j: (0, 0)),            # weights, replicated
            pl.BlockSpec((OC, 1), lambda n, j: (0, 0)),            # bias, replicated
            pl.BlockSpec((None, K, TM), lambda n, j: (n, 0, j)),   # patch tile
        ],
        out_specs=pl.BlockSpec((None, OC, TM), lambda n, j: (n, 0, j)),
        compiler_params=pltpu.CompilerParams(
            dimension_semantics=("parallel", "parallel"),
            vmem_limit_bytes=_VMEM_LIMIT_BYTES,
            allow_input_fusion=[False, False, True],
        ),
        cost_estimate=pl.CostEstimate(
            flops=2 * N * Mhw * K * OC,
            transcendentals=0,
            bytes_accessed=N * K * Mhw * 2 + OC * K * 2 + OC * 4
            + N * OC * Mhw * out_bytes,
        ),
    )(w_scaled, bias, patches)

    if Mpad != Mhw:
        out = out[:, :, :Mhw]
    # Already NCHW-ordered: this reshape is metadata-only (no transpose copy).
    return out.reshape(N, OC, Ho, Wo)


if __name__ == "__main__":
    # Small shapes consistent with the module: N=2, C_in=4, H=W=16, C_out=8.
    key = jax.random.PRNGKey(0)
    k_x, k_w, k_g, k_b, k_m, k_v = jax.random.split(key, 6)

    N, C_in, H, W = 2, 4, 16, 16
    C_out = 8

    x = jax.random.normal(k_x, (N, C_in, H, W), dtype=jnp.float32)
    conv_w = jax.random.normal(k_w, (C_out, C_in, 4, 4), dtype=jnp.float32) * 0.1
    gamma = 1.0 + 0.1 * jax.random.normal(k_g, (C_out,), dtype=jnp.float32)
    beta = 0.1 * jax.random.normal(k_b, (C_out,), dtype=jnp.float32)
    running_mean = 0.1 * jax.random.normal(k_m, (C_out,), dtype=jnp.float32)
    running_var = jnp.abs(
        1.0 + 0.1 * jax.random.normal(k_v, (C_out,), dtype=jnp.float32)
    )

    y = downsample_x4(x, conv_w, gamma, beta, running_mean, running_var)
    jax.block_until_ready(y)

    # Pure-JAX f32 reference: conv (stride 4, VALID) -> BN (eval fold) -> ReLU.
    ref = jax.lax.conv_general_dilated(
        x, conv_w, window_strides=(4, 4), padding="VALID",
        dimension_numbers=("NCHW", "OIHW", "NCHW"))
    s = gamma / jnp.sqrt(running_var + 1e-5)
    b = beta - running_mean * s
    ref = jnp.maximum(ref * s[None, :, None, None] + b[None, :, None, None], 0.0)

    assert y.shape == (N, C_out, H // 4, W // 4)
    # bf16 MXU inputs + bf16 output (f32 accumulation): loosened tolerance vs f32 ref.
    assert jnp.allclose(y.astype(jnp.float32), ref, atol=5e-2, rtol=5e-2)

    print("KERNEL_OK")
</pallas_src>

<mosaic_0001>
module attributes {stable_mosaic.version = 11 : i64} {
  func.func @_matmul_bias_relu_kernel(%arg0: i32, %arg1: i32, %arg2: memref<8x64xbf16, #tpu.memory_space<vmem>>, %arg3: memref<8x1xf32, #tpu.memory_space<vmem>>, %arg4: memref<1x64x128xbf16, #tpu.memory_space<vmem>>, %arg5: memref<1x8x128xbf16, #tpu.memory_space<vmem>>) attributes {dimension_semantics = [#tpu.dimension_semantics<parallel>, #tpu.dimension_semantics<parallel>], iteration_bounds = array<i64: 2, 1>, scalar_prefetch = 0 : i64, scratch_operands = 0 : i64, tpu.core_type = #tpu.core_type<tc>, window_params = [{pipeline_mode = #tpu.pipeline_mode<synchronous>, transform_indices = @transform_0, window_bounds = array<i64: 8, 64>}, {pipeline_mode = #tpu.pipeline_mode<synchronous>, transform_indices = @transform_1, window_bounds = array<i64: 8, 1>}, {transform_indices = @transform_2, window_bounds = array<i64: 1, 64, 128>}, {transform_indices = @transform_3, window_bounds = array<i64: 1, 8, 128>}]} {
    %c0 = arith.constant 0 : index
    %c0_0 = arith.constant 0 : index
    %0 = vector.load %arg2[%c0, %c0_0] : memref<8x64xbf16, #tpu.memory_space<vmem>>, vector<8x64xbf16>
    %c0_1 = arith.constant 0 : index
    %c0_2 = arith.constant 0 : index
    %c0_3 = arith.constant 0 : index
    %1 = vector.load %arg4[%c0_1, %c0_2, %c0_3] : memref<1x64x128xbf16, #tpu.memory_space<vmem>>, vector<1x64x128xbf16>
    %2 = vector.shape_cast %1 : vector<1x64x128xbf16> to vector<64x128xbf16>
    %cst = arith.constant dense<0.000000e+00> : vector<8x128xf32>
    %3 = tpu.matmul %0, %2, %cst {dimension_numbers = #tpu.dot_dimension_numbers<[1], [0], [0], [1], [0, 0, 1, 1], [], []>} : vector<8x64xbf16>, vector<64x128xbf16>, vector<8x128xf32> -> vector<8x128xf32>
    %c0_4 = arith.constant 0 : index
    %c0_5 = arith.constant 0 : index
    %4 = vector.load %arg3[%c0_4, %c0_5] : memref<8x1xf32, #tpu.memory_space<vmem>>, vector<8x1xf32>
    %5 = vector.broadcast %4 : vector<8x1xf32> to vector<8x128xf32>
    %6 = arith.addf %3, %5 : vector<8x128xf32>
    %cst_6 = arith.constant 0.000000e+00 : f32
    %7 = vector.broadcast %cst_6 : f32 to vector<8x128xf32>
    %8 = arith.maximumf %6, %7 : vector<8x128xf32>
    %9 = arith.truncf %8 : vector<8x128xf32> to vector<8x128xbf16>
    %c0_7 = arith.constant 0 : index
    %c0_8 = arith.constant 0 : index
    %c0_9 = arith.constant 0 : index
    %10 = vector.load %arg5[%c0_7, %c0_8, %c0_9] : memref<1x8x128xbf16, #tpu.memory_space<vmem>>, vector<1x8x128xbf16>
    %11 = vector.shape_cast %10 : vector<1x8x128xbf16> to vector<8x128xbf16>
    %12 = vector.shape_cast %9 : vector<8x128xbf16> to vector<1x8x128xbf16>
    tpu.vector_store %arg5[%c0_7, %c0_8, %c0_9], %12 {strides = array<i32>} : memref<1x8x128xbf16, #tpu.memory_space<vmem>>, vector<1x8x128xbf16>,
    return
  }
  func.func @transform_0(%arg0: i32, %arg1: i32) -> (i32, i32) {
    %c0_i32 = arith.constant 0 : i32
    %c0_i32_0 = arith.constant 0 : i32
    %c0_i32_1 = arith.constant 0 : i32
    return %c0_i32, %c0_i32_0 : i32, i32
  }
  func.func @transform_1(%arg0: i32, %arg1: i32) -> (i32, i32) {
    %c0_i32 = arith.constant 0 : i32
    %c0_i32_0 = arith.constant 0 : i32
    %c0_i32_1 = arith.constant 0 : i32
    return %c0_i32, %c0_i32_0 : i32, i32
  }
  func.func @transform_2(%arg0: i32, %arg1: i32) -> (i32, i32, i32) {
    %c0_i32 = arith.constant 0 : i32
    %c0_i32_0 = arith.constant 0 : i32
    return %arg0, %c0_i32, %arg1 : i32, i32, i32
  }
  func.func @transform_3(%arg0: i32, %arg1: i32) -> (i32, i32, i32) {
    %c0_i32 = arith.constant 0 : i32
    %c0_i32_0 = arith.constant 0 : i32
    return %arg0, %c0_i32, %arg1 : i32, i32, i32
  }
}

</mosaic_0001>

<bundles_post_ra>
// kernel: tpu_custom_call.1
= control target key start
LH: loop header
LB: loop body
LE: loop exit
PB: predicated region body
PF: predicated region fallthrough
CT: control target
= control target key end

     0   :  { %8 = vsyncpa [#allocation3], 0  ;;  %s732_s0 = inlined_call_operand.vmem [shape: bf16[8,64], index: 0, kind: input, shape index: {}]   ;;  %s733_s1 = inlined_call_operand.vmem [shape: f32[8,1], index: 1, kind: input, shape index: {}]   ;;  %s734_s2 = inlined_call_operand.hbm [shape: bf16[2,64,128], index: 2, kind: input, shape index: {}]   ;;  %s735_s3 = inlined_call_operand.hbm [shape: bf16[2,8,128], index: 3, kind: output, shape index: {}]  }
   0x1   :  { %10 = vsyncpa [#allocation3 + $0x1], 0 }
   0x2   :  { %11 = vsyncpa [#allocation4], 0 }
   0x3   :  { %13 = vsyncpa [#allocation4 + $0x1], 0  ;;  %s605_s12 = smov 0   ;;  %s607_s13 = smov 0  }
   0x4   :  { %s609_s14 = smov 0   ;;  %s611_s15 = smov 0  }
   0x5   :  { %s613_s16 = smov 0   ;;  %s615_s17 = smov 0  }
   0x6 LB: > { %s366_s18 = sadd.s32 4294967295, %s580_s17   ;;  %s367_s19 = sadd.s32 4294967294, %s580_s17   ;;  %s580_s17 = sphi %s615_s17, %s19_s17   ;;  %s576_s16 = sphi %s613_s16, %s744_s16   ;;  %s572_s15 = sphi %s611_s15, %s743_s15   ;;  %s568_s14 = sphi %s609_s14, %s742_s14   ;;  %s564_s13 = sphi %s607_s13, %s741_s13   ;;  %s560_s12 = sphi %s605_s12, %s740_s12  }
   0x7   : > { %s31_s20 = sadd.s32 1, %s576_s16  ;;  %s82_s21 = sadd.s32 1, %s568_s14 }
   0x8   : > { %p33_p0 = scmp.ge.s32.totalorder %s31_s20, 2  ;;  %p89_p1 = scmp.ne.s32.totalorder %s568_s14, %s564_s13 }
   0x9   : > { %p90_p2 = scmp.eq.s32.totalorder %s580_s17, 0  ;;  %p95_p3 = scmp.ne.s32.totalorder %s564_s13, %s560_s12 }
   0xa   : > { %s746_s20 = smov (%p33_p0, %s31_s20), 0  ;;  %p96_p5 = scmp.eq.s32.totalorder %s366_s18, 0 }
   0xb   : > { %p646_p4 = por %p90_p2, %p89_p1  ;;  %s77_s23 = ssub.s32 %s576_s16, %s746_s20 }
   0xc   : > { %p121_p6 = scmp.eq.s32.totalorder %s366_s18, 1  ;;  %p80_p7 = scmp.eq.s32.totalorder %s77_s23, 0 }
   0xd   : > { %p652_p8 = por %p96_p5, %p95_p3  ;;  %p127_p10 = scmp.eq.s32.totalorder %s367_s19, 1 }
   0xe   : > { %p656_p9 = por %p121_p6, %p89_p1  ;;  %p369_p12 = scmp.ge.s32.totalorder %s580_s17, 2 }
   0xf   : > { %s661_s26 = scalar_select %p80_p7, %s568_s14, %s82_s21  }
  0x10   : > { %p663_p11 = por %p127_p10, %p95_p3  ;;  %p414_p13 = scmp.lt.s32.totalorder %s580_s17, 2 }
  0x11   : > { %s153_s28 = sand.u32 1, %s568_s14   ;;  %s397_s30 = sshll.u32 %s576_s16, 5 }
  0x12   : > { %s370_s29 = sshll.u32 %s153_s28, 5  ;;  %s163_s6 = scalar_lea.hbm %s734_s2, %s397_s30 }
  0x13   : > { %s157_s7 = scalar_lea.vmem [#allocation2], %s370_s29  ;;  %s164_s9 = sshll.u32 %s163_s6, 4  ;;  %s165_s9 = int_to_ptr.hbm [resolvable:$true] %s164_s9 }
  0x14   : > { %s166_s8 = sshll.u32 %s157_s7, 4  ;;  %p407_p0 = pnand %p414_p13, %p646_p4  ;;  %s167_s8 = int_to_ptr.vmem [resolvable:$true] %s166_s8 }
  0x15   : > { %p373_p1 = scmp.ge.s32.totalorder %s580_s17, 1  ;;  %s154_s10 = scalar_lea.sflag [#allocation3], %s153_s28 }
  0x16   : > { %s582_s11 = smov 64   ;;  %s583_s18 = smov 4  }
  0x17   : > { %409 = dma.hbm_to_vmem [thread:$0]  (!%p407_p0), %s165_s9, 512, %s167_s8, %s154_s10, %s582_s11, %s582_s11, %s583_s18  }
  0x18   : > { %p174_p2 = scmp.lt.s32.totalorder %s580_s17, 3 }
  0x1a   : > { %p175_p3 = pnand %p373_p1, %p174_p2 }
  0x1b   : > { %s679_s19 = sand.u32 (!%p175_p3), 1, %s564_s13  }
  0x1c   : > { %178 = sbr.rel (%p175_p3) target bundleno = 186 (0xba), region = 32  ;;  %s374_s21 = sshll.u32 (!%p175_p3), %s679_s19, 5 }
  0x1d   : > { %s181_s23 = scalar_lea.sflag (!%p175_p3), [#allocation3], %s679_s19  ;;  %s184_s29 = scalar_lea.vmem (!%p175_p3), [#allocation2], %s374_s21 }
  0x21   : > { %551 = dma.done.wait (%p652_p8), %s181_s23, 512  }
  0x22   : > { %553 = vsyncadd (%p652_p8), %s181_s23, 4294966784  ;;  %v584_v0 = vmov 0   ;;  %v401_v1 = vld [vmem:[%s184_s29 + $0x18] sm:$0xff]  ;;  %v218_v2 = vld [vmem:[%s733_s1] sm:$0xff]  ;;  %vm248_vm0 = vcmask 523264   ;;  %s375_s4 = sshll.u32 %s679_s19, 2 }
  0x23   : > { %467 = vset.pattern.permute.xlu0 %v584_v0  ;;  %256 = vmatpush.bf16.msra.mxu0 %v401_v1  ;;  %v400_v3 = vld [vmem:[%s184_s29 + $0x10] sm:$0xff]  ;;  %v399_v4 = vld [vmem:[%s184_s29 + $0x8] sm:$0xff]  ;;  %v398_v5 = vld [vmem:[%s184_s29] sm:$0xff]  ;;  %s394_s5 = sshll.u32 %s572_s15, 2  ;;  %s207_s9 = scalar_lea.vmem [#allocation5], %s375_s4 }
  0x24   : > { %221 = vperm.xlu0 %467, %v218_v2   ;;  %v209_v6 = vld [vmem:[%s732_s0] sm:$0xf]  ;;  %s280_s8 = scalar_lea.hbm %s735_s3, %s394_s5  ;;  %s282_s10 = sshll.u32 %s207_s9, 4  ;;  %s283_s10 = int_to_ptr.vmem [resolvable:$true] %s282_s10 }
  0x25   : > { %s284_s11 = sshll.u32 %s280_s8, 4  ;;  %s269_s18 = scalar_lea.sflag [#allocation4], %s679_s19  ;;  %s285_s11 = int_to_ptr.hbm [resolvable:$true] %s284_s11 }
  0x26   : > { %s512_s21 = sshra.s32 %s285_s11, 4  ;;  %s518_s22 = scalar_lea.hbm %s735_s3, 8  ;;  %s513_s21 = int_to_ptr.hbm [resolvable:$true] %s512_s21 }
  0x27   : > { %257 = vmatpush.bf16.msra.mxu0 %v400_v3  ;;  %s514_s15 = scalar_lea.hbm %s513_s21, 4  ;;  %p519_p7 = scmp.lt.s32.totalorder %s513_s21, %s735_s3 }
  0x28   : > { %p515_p4 = scmp.ne.s32.totalorder %s513_s21, %s514_s15  ;;  %p520_p8 = scmp.lt.s32.totalorder %s518_s22, %s514_s15 }
  0x2a   : > { %p516_p5 = pnand %p515_p4, %p656_p9  ;;  %p521_p10 = por %p520_p8, %p519_p7 }
  0x2b   : > { %258 = vmatpush.bf16.msra.mxu0 %v399_v4 }
  0x2c   : > { %p517_p6 = pneg %p516_p5 }
  0x2e   : > { %p522_p13 = pnand %p521_p10, %p517_p6 }
  0x2f   : > { %259 = vmatpush.bf16.msra.mxu0 %v398_v5 }
  0x32   : > { %392 = vmatmul.msk.bf16.vlgmr.msra.gmra.mxu0 %vm248_vm0, %v209_v6 }
  0x96   : > { %v222_v7 = vpop.permute.xlu0 %221 }
  0xaf   : > { %v261_v8 = vpop.f32.mrf.mxu0 }
  0xb0   : > { %v262_v9 = vadd.f32 %v261_v8, %v222_v7 }
  0xb2   : > { %v265_v10 = vmax.f32 %v262_v9, 0.0 }
  0xb4   : > { %v266_v11 = vpack.c.bf16 %v265_v10, %v265_v10 }
  0xb6   : > { %267 = vst [vmem:[%s207_s9] sm:$0xf] %v266_v11 }
  0xb7   : > { %v263_v12 = vpop.f32.mrf.mxu0 }
  0xb8   : > { %525 = shalt.err (!%p522_p13)
}
  0xb9   : > { %404 = dma.vmem_to_hbm [thread:$0]  (%p656_p9), %s283_s10, 64, %s285_s11, %s269_s18  }
  0xba PF: > { %s296_s19 = sand.u32 1, %s560_s12   ;;  %p411_p0 = pnand %p369_p12, %p663_p11 }
  0xbb   : > { %s297_s24 = scalar_lea.sflag [#allocation4], %s296_s19 }
  0xbc   : > { %p412_p1 = pneg %p411_p0 }
  0xbe   : > { %555 = dma.done.wait (%p412_p1), %s297_s24, 64  }
  0xbf   : > { %557 = vsyncadd (%p412_p1), %s297_s24, 4294967232  ;;  %s19_s17 = sadd.s32 1, %s580_s17   ;;  %s740_s12 = smov %s564_s13 }
  0xc0   : > { %p16_p2 = scmp.ge.s32.totalorder %s19_s17, 4   ;;  %s741_s13 = smov %s568_s14 }
  0xc1   : > { %s742_s14 = smov %s661_s26  ;;  %s743_s15 = smov %s576_s16 }
  0xc2   : > { %s744_s16 = smov %s746_s20  ;;  %18 = sbr.rel (!%p16_p2) target bundleno = 6 (0x6), region = 77 }
  0xc7   :  { %303 = vsyncpa [#allocation3], 1 }
  0xc8   :  { %305 = vsyncpa [#allocation3 + $0x1], 1 }
  0xc9   :  { %306 = vsyncpa [#allocation4], 1 }
  0xca   :  { %308 = vsyncpa [#allocation4 + $0x1], 1 }

</bundles_post_ra>
